<compile_context>
chip_gen: v6e
topology: v6e:2x2x1
jax: 0.10.0
libtpu: 0.0.40
codegen_flags: <defaults>
</compile_context>

<pallas_src>
import functools

import jax
import jax.numpy as jnp
from jax import lax
from jax.experimental import pallas as pl
from jax.experimental.pallas import tpu as pltpu

# Sentinel label for padded rows/columns.  int32 min cannot collide with any
# realistic class id (a user label equal to int32 min would alias padding).
_PAD_LABEL = int(jnp.iinfo(jnp.int32).min)
_NEG_BIG = -1e30


def _round_up(x, m):
    return (x + m - 1) // m * m


def _chip_params():
    """Per-generation knobs: (vmem_ceiling_bytes, lane_align, default_tile_m, n_cores)."""
    kind = ''
    try:
        kind = jax.devices()[0].device_kind.lower()
    except Exception:
        pass
    cap = None
    try:
        cap = int(pltpu.get_tpu_info().vmem_capacity_bytes)
    except Exception:
        cap = None
    if 'v7' in kind:
        cap = min(cap or (64 << 20), 64 << 20)          # 64 MiB per TensorCore
        return int(0.875 * cap), 256, 128, 2            # 2 TCs, 256-wide MXU
    if 'v6' in kind:
        return int(0.85 * (cap or (128 << 20))), 256, 256, 1
    if 'v5' in kind or 'v4' in kind:
        return int(0.85 * (cap or (128 << 20))), 128, 256, 1
    if 'v3' in kind or 'v2' in kind:
        return int(0.85 * (cap or (16 << 20))), 128, 128, 1
    # Unknown generation: conservative defaults.
    return int(0.85 * (cap or (64 << 20))), 128, 128, 1


def _resident_spec(block_shape, index_map):
    """Resident block (same index every grid step): single-buffer it."""
    try:
        return pl.BlockSpec(block_shape, index_map, pipeline_mode=pl.Buffered(1))
    except Exception:                       # older jax without pipeline_mode
        return pl.BlockSpec(block_shape, index_map)


def _logits_from_scores(anchor_ref, contrast_ref, col_ids, n_valid):
    """[TM, NP] stabilized logits; anchor already carries the 1/T scale."""
    # Transpose-free MXU contraction over the (padded) feature dim.
    s = lax.dot_general(anchor_ref[...], contrast_ref[...],
                        dimension_numbers=(((1,), (1,)), ((), ())),
                        preferred_element_type=jnp.float32)          # [TM, NP]
    # One broadcast add pushes padded columns to -1e30: they lose the row max
    # and underflow to exp(...) == 0, so no further column-valid masking.
    col_bias = jnp.where(col_ids < n_valid, 0.0, _NEG_BIG)           # [1, NP]
    s = s + col_bias
    # Row max includes the self-contrast diagonal, exactly like torch;
    # the max is detached (forward value unchanged).
    row_max = jnp.max(s, axis=1, keepdims=True)
    return s - lax.stop_gradient(row_max)


def _finish(logits, diag, pos_logit_sum, pos_cnt, temperature, base_temperature):
    """Per-anchor-row SupCon loss from row-wise positive statistics."""
    # Denominator excludes only the self-contrast column (padded columns
    # already underflowed to exp(-1e30) == 0).
    exp_logits = jnp.where(diag, 0.0, jnp.exp(logits))                # EUP exp
    log_denom = jnp.log(jnp.sum(exp_logits, axis=1, keepdims=True))   # [TM, 1]
    # sum(mask*log_prob) == sum(mask*logits) - cnt*log(denom); exact divide
    # (pos_cnt is a small exact integer).  cnt == 0 -> NaN, like torch; padded
    # rows are zeroed by the caller.
    mean_log_prob_pos = (pos_logit_sum - pos_cnt * log_denom) / pos_cnt
    return (-(temperature / base_temperature)) * mean_log_prob_pos    # [TM, 1]


def _supcon_labels_kernel(col_ids_ref, clab_ref, alab_ref, anchor_ref,
                          contrast_ref, out_ref, *, temperature,
                          base_temperature, n_valid, m_valid):
    """Fast path: positive/self masks built in-kernel from int32 labels."""
    tile_m = anchor_ref.shape[0]
    row_off = pl.program_id(0) * tile_m

    col_ids = col_ids_ref[...]                                        # [1, NP]
    row_ids = lax.broadcasted_iota(jnp.int32, (tile_m, 1), 0) + row_off
    diag = col_ids == row_ids                                         # [TM, NP] via bcast

    logits = _logits_from_scores(anchor_ref, contrast_ref, col_ids, n_valid)

    # Positives: same label and not the self-contrast column.  Padded rows and
    # columns carry the _PAD_LABEL sentinel so they never match real labels.
    pos = jnp.logical_and(alab_ref[...] == clab_ref[...], jnp.logical_not(diag))
    pos_cnt = jnp.sum(jnp.where(pos, 1.0, 0.0), axis=1, keepdims=True)
    pos_logit_sum = jnp.sum(jnp.where(pos, logits, 0.0), axis=1, keepdims=True)

    loss = _finish(logits, diag, pos_logit_sum, pos_cnt,
                   temperature, base_temperature)
    out_ref[...] = jnp.where(row_ids < m_valid, loss, 0.0)


def _supcon_mask_kernel(col_ids_ref, pos_ref, anchor_ref, contrast_ref, out_ref,
                        *, temperature, base_temperature, n_valid, m_valid):
    """Fallback path for an explicit (possibly asymmetric) user-provided mask."""
    tile_m = anchor_ref.shape[0]
    row_off = pl.program_id(0) * tile_m

    col_ids = col_ids_ref[...]                                        # [1, NP]
    row_ids = lax.broadcasted_iota(jnp.int32, (tile_m, 1), 0) + row_off
    diag = col_ids == row_ids

    logits = _logits_from_scores(anchor_ref, contrast_ref, col_ids, n_valid)

    # int8 user mask (padded entries are 0); zero the self-contrast diagonal.
    pos_w = jnp.where(diag, 0.0, pos_ref[...].astype(jnp.float32))
    pos_cnt = jnp.sum(pos_w, axis=1, keepdims=True)
    pos_logit_sum = jnp.sum(pos_w * logits, axis=1, keepdims=True)

    loss = _finish(logits, diag, pos_logit_sum, pos_cnt,
                   temperature, base_temperature)
    out_ref[...] = jnp.where(row_ids < m_valid, loss, 0.0)


def supcon_loss(features, labels=None, mask=None, temperature=0.07,
                contrast_mode='all', base_temperature=0.07,
                tile_m=None, use_bf16_matmul=True):
    """JAX/Pallas port of SupConLoss.forward (contrast_mode 'all' or 'one').

    use_bf16_matmul=True (default) feeds bf16 operands to the MXU with f32
    accumulation; 1/temperature is folded into the f32 anchor before the cast.
    """
    if features.ndim < 3:
        raise ValueError('`features` needs to be [bsz, n_views, ...]')
    bsz, n_views = features.shape[0], features.shape[1]
    features = features.reshape(bsz, n_views, -1).astype(jnp.float32)
    feat_dim = features.shape[-1]

    if labels is not None and mask is not None:
        raise ValueError('Cannot define both `labels` and `mask`')

    contrast_count = n_views
    # torch.cat(torch.unbind(features, 1), 0): view-major stacking -> [N, D]
    contrast_feature = jnp.transpose(features, (1, 0, 2)).reshape(
        contrast_count * bsz, feat_dim)
    if contrast_mode == 'one':
        anchor_feature = features[:, 0, :]
        anchor_count = 1
    elif contrast_mode == 'all':
        anchor_feature = contrast_feature
        anchor_count = contrast_count
    else:
        raise ValueError('Unknown mode: {}'.format(contrast_mode))

    M = anchor_count * bsz
    N = contrast_count * bsz
    mask_path = mask is not None

    vmem_ceiling, lane_align, default_tile_m, n_cores = _chip_params()
    n_pad = _round_up(N, lane_align)
    d_pad = _round_up(feat_dim, 128)
    esize = 2 if use_bf16_matmul else 4
    feat_dtype = jnp.bfloat16 if use_bf16_matmul else jnp.float32

    # Sublane granularity of the per-step tiles (f32: 8, bf16: 16, int8: 32).
    gran = 32 if mask_path else (16 if use_bf16_matmul else 8)

    def est_vmem(tm):
        v = n_pad * d_pad * esize            # resident contrast (single-buffered)
        v += 2 * tm * d_pad * esize          # anchor tile (double-buffered)
        v += 4 * n_pad * 4                   # resident col-id / contrast-label rows
        v += 4 * tm * 4                      # anchor-label + per-row-loss blocks
        if mask_path:
            v += 2 * tm * n_pad              # int8 positives tile
        v += 6 * tm * n_pad * 4              # in-kernel [TM, NP] f32 temporaries
        return v

    # Tile selection: start from the generation default, never much larger than
    # M, prefer >=2 grid steps when this chip has 2 TensorCores (megacore), and
    # shrink until the VMEM estimate fits the generation ceiling.
    tm = default_tile_m if tile_m is None else int(tile_m)
    tm = max(gran, _round_up(min(tm, _round_up(M, gran)), gran))
    if n_cores > 1 and M >= 2 * gran:
        tm = min(tm, _round_up((M + 1) // 2, gran))
    while est_vmem(tm) > vmem_ceiling and tm > gran:
        tm = max(gran, _round_up(tm // 2, gran))
    tile_m = tm

    m_pad = _round_up(M, tile_m)
    num_tiles = m_pad // tile_m

    # Fold 1/temperature into the f32 anchor *before* the optional bf16 cast
    # (cheaper than scaling [M, N] logits, no extra bf16 rounding).
    inv_t = jnp.float32(1.0 / float(temperature))
    anchor = jnp.pad((anchor_feature * inv_t).astype(feat_dtype),
                     ((0, m_pad - M), (0, d_pad - feat_dim)))
    contrast = jnp.pad(contrast_feature.astype(feat_dtype),
                       ((0, n_pad - N), (0, d_pad - feat_dim)))
    col_ids = jnp.arange(n_pad, dtype=jnp.int32).reshape(1, n_pad)

    anchor_spec = pl.BlockSpec((tile_m, d_pad), lambda i: (i, 0))
    contrast_spec = _resident_spec((n_pad, d_pad), lambda i: (0, 0))
    col_ids_spec = _resident_spec((1, n_pad), lambda i: (0, 0))
    out_spec = pl.BlockSpec((tile_m, 1), lambda i: (i, 0))
    out_shape = jax.ShapeDtypeStruct((m_pad, 1), jnp.float32)

    common = dict(temperature=float(temperature),
                  base_temperature=float(base_temperature),
                  n_valid=N, m_valid=M)

    if not mask_path:
        if labels is None:
            base_labels = jnp.arange(bsz, dtype=jnp.int32)   # eye mask == unique ids
        else:
            base_labels = jnp.asarray(labels).reshape(-1).astype(jnp.int32)
            if base_labels.shape[0] != bsz:
                raise ValueError('Num of labels does not match num of features')
        col_labels = jnp.tile(base_labels, contrast_count)                  # [N]
        anchor_labels = (col_labels if anchor_count == contrast_count
                         else base_labels)                                  # [M]
        col_labels = jnp.pad(col_labels, (0, n_pad - N),
                             constant_values=_PAD_LABEL).reshape(1, n_pad)
        anchor_labels = jnp.pad(anchor_labels, (0, m_pad - M),
                                constant_values=_PAD_LABEL).reshape(m_pad, 1)
        kernel = functools.partial(_supcon_labels_kernel, **common)
        in_specs = [
            col_ids_spec,                                     # resident col ids
            _resident_spec((1, n_pad), lambda i: (0, 0)),     # resident col labels
            pl.BlockSpec((tile_m, 1), lambda i: (i, 0)),      # anchor-label tile
            anchor_spec, contrast_spec,
        ]
        args = (col_ids, col_labels, anchor_labels, anchor, contrast)
        mask_hbm = 0
    else:
        # Explicit user mask (rare, possibly asymmetric).  DMA'd as int8 to cut
        # the dominant [M, N] HBM stream 4x; the self-contrast logits_mask is
        # still built in-kernel.
        # TODO(synk): non-binary float masks are rounded to int8 here (the
        #             reference mask is {0,1}-valued per its docstring).
        pos_tiled = jnp.tile(jnp.asarray(mask, jnp.float32),
                             (anchor_count, contrast_count))                # [M, N]
        pos_i8 = jnp.pad(jnp.round(pos_tiled).astype(jnp.int8),
                         ((0, m_pad - M), (0, n_pad - N)))
        kernel = functools.partial(_supcon_mask_kernel, **common)
        in_specs = [
            col_ids_spec,
            pl.BlockSpec((tile_m, n_pad), lambda i: (i, 0)),  # int8 positives tile
            anchor_spec, contrast_spec,
        ]
        args = (col_ids, pos_i8, anchor, contrast)
        mask_hbm = m_pad * n_pad

    vmem_limit = int(min(max(est_vmem(tile_m) + (4 << 20), 8 << 20), vmem_ceiling))
    cost = pl.CostEstimate(
        flops=2 * m_pad * n_pad * d_pad + 10 * m_pad * n_pad,
        transcendentals=m_pad * n_pad + 2 * m_pad,
        bytes_accessed=(m_pad + n_pad) * d_pad * esize + mask_hbm
                       + (2 * m_pad + 2 * n_pad) * 4,
    )

    per_row = pl.pallas_call(
        kernel,
        out_shape=out_shape,
        grid=(num_tiles,),
        in_specs=in_specs,
        out_specs=out_spec,
        compiler_params=pltpu.CompilerParams(
            dimension_semantics=("parallel",),    # each tile owns its output block
            vmem_limit_bytes=vmem_limit),
        cost_estimate=cost,
    )(*args)

    # Padded rows were zeroed in-kernel; mean over the M real anchors
    # (== loss.view(anchor_count, batch_size).mean() in torch).
    return jnp.sum(per_row) / M


def _supcon_reference(features, labels=None, mask=None, temperature=0.07,
                      contrast_mode='all', base_temperature=0.07):
    """Pure-JAX transcription of the torch reference (for validation)."""
    bsz, n_views = features.shape[0], features.shape[1]
    feats = features.reshape(bsz, n_views, -1).astype(jnp.float32)
    contrast = jnp.transpose(feats, (1, 0, 2)).reshape(n_views * bsz, -1)
    if contrast_mode == 'one':
        anchor, anchor_count = feats[:, 0, :], 1
    else:
        anchor, anchor_count = contrast, n_views
    if labels is None and mask is None:
        m = jnp.eye(bsz, dtype=jnp.float32)
    elif labels is not None:
        lab = jnp.asarray(labels).reshape(-1, 1)
        m = (lab == lab.T).astype(jnp.float32)
    else:
        m = jnp.asarray(mask, jnp.float32)
    logits = jnp.dot(anchor, contrast.T,
                     precision=jax.lax.Precision.HIGHEST) / temperature
    logits = logits - jnp.max(logits, axis=1, keepdims=True)
    M, N = anchor_count * bsz, n_views * bsz
    m = jnp.tile(m, (anchor_count, n_views))
    lm = 1.0 - jnp.eye(M, N, dtype=jnp.float32)
    m = m * lm
    exp_logits = jnp.exp(logits) * lm
    log_prob = logits - jnp.log(exp_logits.sum(1, keepdims=True))
    mean_log_prob_pos = (m * log_prob).sum(1) / m.sum(1)
    return (-(temperature / base_temperature) * mean_log_prob_pos).mean()


if __name__ == "__main__":
    key = jax.random.PRNGKey(0)
    k_feat, k_lab = jax.random.split(key)

    bsz, n_views, feat_dim = 8, 2, 32
    features = jax.random.normal(k_feat, (bsz, n_views, feat_dim), dtype=jnp.float32)
    # L2-normalize feature vectors (typical SupCon usage; not required by the math)
    features = features / jnp.linalg.norm(features, axis=-1, keepdims=True)
    labels = jax.random.randint(k_lab, (bsz,), 0, 4)

    ref_sup = _supcon_reference(features, labels=labels)

    # supervised path, f32 MXU operands
    loss_sup_f32 = jax.block_until_ready(
        supcon_loss(features, labels=labels, use_bf16_matmul=False))
    assert jnp.isfinite(loss_sup_f32)
    assert jnp.allclose(loss_sup_f32, ref_sup, rtol=5e-2, atol=5e-2)

    # supervised path with the default bf16 MXU operands (loose tolerance)
    loss_sup_bf16 = jax.block_until_ready(supcon_loss(features, labels=labels))
    assert jnp.isfinite(loss_sup_bf16)
    assert jnp.allclose(loss_sup_bf16, ref_sup, rtol=1e-1, atol=1e-1)

    # unsupervised SimCLR path and the explicit-mask fallback must agree
    loss_unsup = jax.block_until_ready(supcon_loss(features))
    loss_mask = jax.block_until_ready(
        supcon_loss(features, mask=jnp.eye(bsz, dtype=jnp.float32)))
    assert jnp.isfinite(loss_unsup) and jnp.isfinite(loss_mask)
    assert jnp.allclose(loss_unsup, loss_mask, rtol=1e-5, atol=1e-5)

    # contrast_mode='one' smoke test
    loss_one = jax.block_until_ready(
        supcon_loss(features, labels=labels, contrast_mode='one'))
    assert jnp.isfinite(loss_one)

    print("KERNEL_OK")
</pallas_src>

<mosaic_0001>
module attributes {stable_mosaic.version = 11 : i64} {
  func.func @_supcon_labels_kernel(%arg0: i32, %arg1: memref<1x128xi32, #tpu.memory_space<vmem>>, %arg2: memref<1x128xi32, #tpu.memory_space<vmem>>, %arg3: memref<16x1xi32, #tpu.memory_space<vmem>>, %arg4: memref<16x128xf32, #tpu.memory_space<vmem>>, %arg5: memref<128x128xf32, #tpu.memory_space<vmem>>, %arg6: memref<16x1xf32, #tpu.memory_space<vmem>>) attributes {dimension_semantics = [#tpu.dimension_semantics<parallel>], iteration_bounds = array<i64: 1>, scalar_prefetch = 0 : i64, scratch_operands = 0 : i64, tpu.core_type = #tpu.core_type<tc>, window_params = [{pipeline_mode = #tpu.pipeline_mode<synchronous>, transform_indices = @transform_0, window_bounds = array<i64: 1, 128>}, {pipeline_mode = #tpu.pipeline_mode<synchronous>, transform_indices = @transform_1, window_bounds = array<i64: 1, 128>}, {transform_indices = @transform_2, window_bounds = array<i64: 16, 1>}, {transform_indices = @transform_3, window_bounds = array<i64: 16, 128>}, {pipeline_mode = #tpu.pipeline_mode<synchronous>, transform_indices = @transform_4, window_bounds = array<i64: 128, 128>}, {transform_indices = @transform_5, window_bounds = array<i64: 16, 1>}]} {
    %c16_i32 = arith.constant 16 : i32
    %0 = arith.muli %arg0, %c16_i32 : i32
    %c0 = arith.constant 0 : index
    %c0_0 = arith.constant 0 : index
    %1 = vector.load %arg1[%c0, %c0_0] : memref<1x128xi32, #tpu.memory_space<vmem>>, vector<1x128xi32>
    %2 = tpu.iota {dimensions = array<i32: 0>} : vector<16x1xi32>
    %3 = vector.broadcast %0 : i32 to vector<16x1xi32>
    %4 = arith.addi %2, %3 : vector<16x1xi32>
    %5 = vector.broadcast %1 : vector<1x128xi32> to vector<16x128xi32>
    %6 = vector.broadcast %4 : vector<16x1xi32> to vector<16x128xi32>
    %7 = arith.cmpi eq, %5, %6 : vector<16x128xi32>
    %c0_1 = arith.constant 0 : index
    %c0_2 = arith.constant 0 : index
    %8 = vector.load %arg4[%c0_1, %c0_2] : memref<16x128xf32, #tpu.memory_space<vmem>>, vector<16x128xf32>
    %c0_3 = arith.constant 0 : index
    %c0_4 = arith.constant 0 : index
    %9 = vector.load %arg5[%c0_3, %c0_4] : memref<128x128xf32, #tpu.memory_space<vmem>>, vector<128x128xf32>
    %cst = arith.constant dense<0.000000e+00> : vector<16x128xf32>
    %10 = tpu.matmul %8, %9, %cst {dimension_numbers = #tpu.dot_dimension_numbers<[1], [1], [0], [0], [0, 0, 1, 0], [], []>} : vector<16x128xf32>, vector<128x128xf32>, vector<16x128xf32> -> vector<16x128xf32>
    %c16_i32_5 = arith.constant 16 : i32
    %11 = vector.broadcast %c16_i32_5 : i32 to vector<1x128xi32>
    %12 = arith.cmpi slt, %1, %11 : vector<1x128xi32>
    %cst_6 = arith.constant 0.000000e+00 : f32
    %cst_7 = arith.constant -1.000000e+30 : f32
    %13 = vector.broadcast %cst_6 : f32 to vector<1x128xf32>
    %14 = vector.broadcast %cst_7 : f32 to vector<1x128xf32>
    %15 = arith.select %12, %13, %14 : vector<1x128xi1>, vector<1x128xf32>
    %16 = vector.broadcast %15 : vector<1x128xf32> to vector<16x128xf32>
    %17 = arith.addf %10, %16 : vector<16x128xf32>
    %cst_8 = arith.constant dense<0xFF800000> : vector<16xf32>
    %18 = vector.multi_reduction <maximumf>, %17, %cst_8 [1] : vector<16x128xf32> to vector<16xf32>
    %19 = vector.shape_cast %18 : vector<16xf32> to vector<16x1xf32>
    %20 = vector.broadcast %19 : vector<16x1xf32> to vector<16x128xf32>
    %21 = arith.subf %17, %20 : vector<16x128xf32>
    %c0_9 = arith.constant 0 : index
    %c0_10 = arith.constant 0 : index
    %22 = vector.load %arg3[%c0_9, %c0_10] : memref<16x1xi32, #tpu.memory_space<vmem>>, vector<16x1xi32>
    %c0_11 = arith.constant 0 : index
    %c0_12 = arith.constant 0 : index
    %23 = vector.load %arg2[%c0_11, %c0_12] : memref<1x128xi32, #tpu.memory_space<vmem>>, vector<1x128xi32>
    %24 = vector.broadcast %22 : vector<16x1xi32> to vector<16x128xi32>
    %25 = vector.broadcast %23 : vector<1x128xi32> to vector<16x128xi32>
    %26 = arith.cmpi eq, %24, %25 : vector<16x128xi32>
    %cst_13 = arith.constant dense<true> : vector<16x128xi1>
    %27 = arith.xori %7, %cst_13 : vector<16x128xi1>
    %28 = arith.andi %26, %27 : vector<16x128xi1>
    %cst_14 = arith.constant 1.000000e+00 : f32
    %cst_15 = arith.constant 0.000000e+00 : f32
    %29 = vector.broadcast %cst_14 : f32 to vector<16x128xf32>
    %30 = vector.broadcast %cst_15 : f32 to vector<16x128xf32>
    %31 = arith.select %28, %29, %30 : vector<16x128xi1>, vector<16x128xf32>
    %cst_16 = arith.constant dense<0.000000e+00> : vector<16xf32>
    %32 = vector.multi_reduction <add>, %31, %cst_16 [1] : vector<16x128xf32> to vector<16xf32>
    %33 = vector.shape_cast %32 : vector<16xf32> to vector<16x1xf32>
    %cst_17 = arith.constant 0.000000e+00 : f32
    %34 = vector.broadcast %cst_17 : f32 to vector<16x128xf32>
    %35 = arith.select %28, %21, %34 : vector<16x128xi1>, vector<16x128xf32>
    %cst_18 = arith.constant dense<0.000000e+00> : vector<16xf32>
    %36 = vector.multi_reduction <add>, %35, %cst_18 [1] : vector<16x128xf32> to vector<16xf32>
    %37 = vector.shape_cast %36 : vector<16xf32> to vector<16x1xf32>
    %38 = math.exp %21 : vector<16x128xf32>
    %cst_19 = arith.constant 0.000000e+00 : f32
    %39 = vector.broadcast %cst_19 : f32 to vector<16x128xf32>
    %40 = arith.select %7, %39, %38 : vector<16x128xi1>, vector<16x128xf32>
    %cst_20 = arith.constant dense<0.000000e+00> : vector<16xf32>
    %41 = vector.multi_reduction <add>, %40, %cst_20 [1] : vector<16x128xf32> to vector<16xf32>
    %42 = vector.shape_cast %41 : vector<16xf32> to vector<16x1xf32>
    %43 = math.log %42 : vector<16x1xf32>
    %44 = arith.mulf %33, %43 : vector<16x1xf32>
    %45 = arith.subf %37, %44 : vector<16x1xf32>
    %46 = arith.divf %45, %33 : vector<16x1xf32>
    %cst_21 = arith.constant -1.000000e+00 : f32
    %47 = vector.broadcast %cst_21 : f32 to vector<16x1xf32>
    %48 = arith.mulf %47, %46 : vector<16x1xf32>
    %c16_i32_22 = arith.constant 16 : i32
    %49 = vector.broadcast %c16_i32_22 : i32 to vector<16x1xi32>
    %50 = arith.cmpi slt, %4, %49 : vector<16x1xi32>
    %cst_23 = arith.constant 0.000000e+00 : f32
    %51 = vector.broadcast %cst_23 : f32 to vector<16x1xf32>
    %52 = arith.select %50, %48, %51 : vector<16x1xi1>, vector<16x1xf32>
    %c0_24 = arith.constant 0 : index
    %c0_25 = arith.constant 0 : index
    %53 = vector.load %arg6[%c0_24, %c0_25] : memref<16x1xf32, #tpu.memory_space<vmem>>, vector<16x1xf32>
    tpu.vector_store %arg6[%c0_24, %c0_25], %52 {strides = array<i32>} : memref<16x1xf32, #tpu.memory_space<vmem>>, vector<16x1xf32>,
    return
  }
  func.func @transform_0(%arg0: i32) -> (i32, i32) {
    %c0_i32 = arith.constant 0 : i32
    %c0_i32_0 = arith.constant 0 : i32
    %c0_i32_1 = arith.constant 0 : i32
    return %c0_i32, %c0_i32_0 : i32, i32
  }
  func.func @transform_1(%arg0: i32) -> (i32, i32) {
    %c0_i32 = arith.constant 0 : i32
    %c0_i32_0 = arith.constant 0 : i32
    %c0_i32_1 = arith.constant 0 : i32
    return %c0_i32, %c0_i32_0 : i32, i32
  }
  func.func @transform_2(%arg0: i32) -> (i32, i32) {
    %c0_i32 = arith.constant 0 : i32
    %c0_i32_0 = arith.constant 0 : i32
    return %arg0, %c0_i32 : i32, i32
  }
  func.func @transform_3(%arg0: i32) -> (i32, i32) {
    %c0_i32 = arith.constant 0 : i32
    %c0_i32_0 = arith.constant 0 : i32
    return %arg0, %c0_i32 : i32, i32
  }
  func.func @transform_4(%arg0: i32) -> (i32, i32) {
    %c0_i32 = arith.constant 0 : i32
    %c0_i32_0 = arith.constant 0 : i32
    %c0_i32_1 = arith.constant 0 : i32
    return %c0_i32, %c0_i32_0 : i32, i32
  }
  func.func @transform_5(%arg0: i32) -> (i32, i32) {
    %c0_i32 = arith.constant 0 : i32
    %c0_i32_0 = arith.constant 0 : i32
    return %arg0, %c0_i32 : i32, i32
  }
}

</mosaic_0001>

<bundles_post_ra>
// kernel: tpu_custom_call.1
= control target key start
LH: loop header
LB: loop body
LE: loop exit
PB: predicated region body
PF: predicated region fallthrough
CT: control target
= control target key end

     0   :  { %10 = vsyncpa [#allocation3], 0  ;;  %s319_s18 = smov [#allocation2]   ;;  %s383_s0 = inlined_call_operand.vmem [shape: s32[1,128], index: 0, kind: input, shape index: {}]   ;;  %s384_s1 = inlined_call_operand.vmem [shape: s32[1,128], index: 1, kind: input, shape index: {}]   ;;  %s385_s2 = inlined_call_operand.vmem [shape: s32[16,1], index: 2, kind: input, shape index: {}]   ;;  %s386_s3 = inlined_call_operand.vmem [shape: f32[16,128], index: 3, kind: input, shape index: {}]   ;;  %s387_s4 = inlined_call_operand.hbm [shape: f32[128,128], index: 4, kind: input, shape index: {}]   ;;  %s388_s5 = inlined_call_operand.vmem [shape: f32[16,1], index: 5, kind: output, shape index: {}]  }
   0x1   :  { %s24_s19 = sshll.u32 %s319_s18, 4  ;;  %s25_s19 = int_to_ptr.vmem [resolvable:$true] %s24_s19 }
   0x2   :  { %s305_s20 = scalar_lea.vmem %s25_s19, 2048  ;;  %p310_p1 = scmp.lt.s32.totalorder %s25_s19, %s25_s19 }
   0x3   :  { %p306_p0 = scmp.ne.s32.totalorder %s25_s19, %s305_s20  ;;  %p311_p2 = scmp.lt.s32.totalorder %s305_s20, %s305_s20 }
   0x5   :  { %p312_p3 = por %p311_p2, %p310_p1 }
   0x7   :  { %p313_p4 = pnand %p312_p3, %p306_p0 }
   0x9   :  { %316 = shalt.err (!%p313_p4)
}
   0xa   :  { %s320_s21 = smov 128   ;;  %s321_s22 = smov 8  }
   0xb   :  { %30 = dma.hbm_to_vmem [thread:$0]  %s387_s4, 2048, %s25_s19, [#allocation3], %s320_s21, %s320_s21, %s321_s22  }
   0xc   :  { %317 = dma.done.wait [#allocation3], 2048  }
   0xd   :  { %318 = vsyncadd [#allocation3], 4294965248  ;;  %v65_v0 = vld [vmem:[#allocation2 + $0x78] sm:$0xff]  ;;  %v64_v1 = vld [vmem:[#allocation2 + $0x70] sm:$0xff]  ;;  %v322_v19 = vmov 0   ;;  %v36_v21 = vlaneseq  ;;  %vm324_vm3 = vmmov 1  }
   0xe   :  { %241 = vmatprep.subr.mxu0 %v65_v0  ;;  %v63_v2 = vld [vmem:[#allocation2 + $0x68] sm:$0xff]  ;;  %v48_v3 = vld [vmem:[%s386_s3] sm:$0xff]  ;;  %v61_v5 = vld [vmem:[#allocation2 + $0x58] sm:$0xff]  ;;  %283 = vset.pattern.permute.xlu1 %v322_v19  ;;  %v323_v25 = vmov -1e+30   ;;  %v325_v45 = vmov 0.0  }
   0xf   :  { %242 = vmatpush3.xpose.msra.mxu0 %v65_v0  ;;  %273 = vmatprep.mubr.f32.mxu0 %v48_v3  ;;  %v62_v4 = vld [vmem:[#allocation2 + $0x60] sm:$0xff]  ;;  %v60_v6 = vld [vmem:[#allocation2 + $0x50] sm:$0xff]  ;;  %v59_v7 = vld [vmem:[#allocation2 + $0x48] sm:$0xff]  ;;  %v37_v23 = vshrl.u32 %v36_v21, 7  ;;  %vm214_vm10 = vcmask 7168  }
  0x10   :  { %243 = vmatprep.subr.mxu0 %v64_v1  ;;  %v58_v8 = vld [vmem:[#allocation2 + $0x40] sm:$0xff]  ;;  %v57_v9 = vld [vmem:[#allocation2 + $0x38] sm:$0xff]  ;;  %v56_v10 = vld [vmem:[#allocation2 + $0x30] sm:$0xff]  ;;  %284 = vset.pattern.permute.xlu0 %v322_v19 }
  0x11   :  { %v55_v11 = vld [vmem:[#allocation2 + $0x28] sm:$0xff]  ;;  %v54_v12 = vld [vmem:[#allocation2 + $0x20] sm:$0xff]  ;;  %v53_v13 = vld [vmem:[#allocation2 + $0x18] sm:$0xff]  ;;  %v44_v24 = vsub.s32 0, %v37_v23  ;;  %v38_v41 = vadd.s32 8, %v37_v23 }
  0x12   :  { %v52_v14 = vld [vmem:[#allocation2 + $0x10] sm:$0xff]  ;;  %v51_v15 = vld [vmem:[#allocation2 + $0x8] sm:$0xff]  ;;  %v50_v16 = vld [vmem:[#allocation2] sm:$0xff] }
  0x13   :  { %244 = vmatpush3.xpose.msra.mxu0 %v64_v1  ;;  %v49_v17 = vld [vmem:[%s386_s3 + $0x8] sm:$0xff]  ;;  %v155_v18 = vld [vmem:[%s385_s2] sm:$0xff] }
  0x14   :  { %245 = vmatprep.subr.mxu0 %v63_v2  ;;  %159 = vperm.xlu1 %283, %v155_v18   ;;  %v156_v20 = vld [vmem:[%s385_s2 + $0x8] sm:$0xff]  ;;  %v35_v22 = vld [vmem:[%s383_s0] sm:$0x1] }
  0x15   :  { %vm66_vm0 = vcmp.lt.s32.totalorder %v35_v22, 16  ;;  %v45_v38 = vrot.slane %v35_v22, %v44_v24  ;;  %v222_v39 = vld [vmem:[%s384_s1] ss:$0 sm:$0xff] }
  0x16   :  { %v67_v26 = vsel %vm66_vm0, 0.0, %v323_v25 }
  0x17   :  { %246 = vmatpush3.xpose.msra.mxu0 %v63_v2  ;;  %v72_v28 = vrot.slane %v67_v26, %v44_v24  ;;  %vm46_vm1 = vcmp.eq.s32.totalorder %v45_v38, %v37_v23  ;;  %vm47_vm5 = vcmp.eq.s32.totalorder %v45_v38, %v38_v41 }
  0x18   :  { %247 = vmatprep.subr.mxu0 %v62_v4  ;;  %162 = vperm.xlu1 %283, %v156_v20   ;;  %vm170_vm4 = vmxor %vm46_vm1, %vm324_vm3 }
  0x19   :  { %vm171_vm8 = vmxor %vm47_vm5, %vm324_vm3 }
  0x1b   :  { %248 = vmatpush3.xpose.msra.mxu0 %v62_v4 }
  0x1c   :  { %249 = vmatprep.subr.mxu0 %v61_v5 }
  0x1f   :  { %250 = vmatpush3.xpose.msra.mxu0 %v61_v5 }
  0x20   :  { %251 = vmatprep.subr.mxu0 %v60_v6 }
  0x23   :  { %252 = vmatpush3.xpose.msra.mxu0 %v60_v6 }
  0x24   :  { %253 = vmatprep.subr.mxu0 %v59_v7 }
  0x27   :  { %254 = vmatpush3.xpose.msra.mxu0 %v59_v7 }
  0x28   :  { %255 = vmatprep.subr.mxu0 %v58_v8 }
  0x2b   :  { %256 = vmatpush3.xpose.msra.mxu0 %v58_v8 }
  0x2c   :  { %257 = vmatprep.subr.mxu0 %v57_v9 }
  0x2f   :  { %258 = vmatpush3.xpose.msra.mxu0 %v57_v9 }
  0x30   :  { %259 = vmatprep.subr.mxu0 %v56_v10 }
  0x33   :  { %260 = vmatpush3.xpose.msra.mxu0 %v56_v10 }
  0x34   :  { %261 = vmatprep.subr.mxu0 %v55_v11 }
  0x37   :  { %262 = vmatpush3.xpose.msra.mxu0 %v55_v11 }
  0x38   :  { %263 = vmatprep.subr.mxu0 %v54_v12 }
  0x3b   :  { %264 = vmatpush3.xpose.msra.mxu0 %v54_v12 }
  0x3c   :  { %265 = vmatprep.subr.mxu0 %v53_v13 }
  0x3f   :  { %266 = vmatpush3.xpose.msra.mxu0 %v53_v13 }
  0x40   :  { %267 = vmatprep.subr.mxu0 %v52_v14 }
  0x43   :  { %268 = vmatpush3.xpose.msra.mxu0 %v52_v14 }
  0x44   :  { %269 = vmatprep.subr.mxu0 %v51_v15 }
  0x47   :  { %270 = vmatpush3.xpose.msra.mxu0 %v51_v15 }
  0x48   :  { %271 = vmatprep.subr.mxu0 %v50_v16 }
  0x4b   :  { %272 = vmatpush3.xpose.msra.mxu0 %v50_v16 }
  0x4e   :  { %274 = vmatmul.mubr.f32.vlgmr.msra.gmra.mxu0 %v49_v17 }
  0x8f   :  { %v160_v40 = vpop.permute.xlu1 %159 }
  0x90   :  { %vm168_vm2 = vcmp.eq.s32.totalorder %v160_v40, %v222_v39 }
  0x91   :  { %vm172_vm6 = vmand %vm168_vm2, %vm170_vm4 }
  0x92   :  { %v174_v46 = vsel %vm172_vm6, 1.0, %v325_v45 }
  0x93   :  { %v163_v44 = vpop.permute.xlu1 %162 }
  0x94   :  { %vm169_vm7 = vcmp.eq.s32.totalorder %v163_v44, %v222_v39 }
  0x95   :  { %vm173_vm9 = vmand %vm169_vm7, %vm171_vm8 }
  0x96   :  { %v175_v49 = vsel %vm173_vm9, 1.0, %v325_v45 }
 0x10e   :  { %v275_v27 = vpop.f32.mrf.mxu0 }
 0x10f   :  { %v146_v31 = vadd.f32 %v275_v27, %v72_v28 }
 0x110   :  { %v140_v29 = vpop.f32.mrf.mxu0 }
 0x111   :  { %v141_v30 = vadd.f32 %v140_v29, %v72_v28 }
 0x113   :  { %149 = vmax.xlane.f32.xlu0 %v141_v30 }
 0x117   :  { %151 = vmax.xlane.f32.xlu0 %v146_v31 }
 0x19c   :  { %v150_v32 = vpop.xlane.xlu0 %149 }
 0x19d   :  { %v153_v33 = vsub.f32 %v141_v30, %v150_v32 }
 0x19f   :  { %v186_v34 = vmul.f32 1.442695, %v153_v33  ;;  %v180_v50 = vsel %vm172_vm6, %v153_v33, 0.0 }
 0x1a0   :  { %v152_v35 = vpop.xlane.xlu0 %151 }
 0x1a1   :  { %285 = vpow2.f32 %v186_v34  ;;  %v154_v36 = vsub.f32 %v146_v31, %v152_v35 }
 0x1a3   :  { %v188_v37 = vmul.f32 1.442695, %v154_v36  ;;  %v181_v51 = vsel %vm173_vm9, %v154_v36, 0.0 }
 0x1a5   :  { %287 = vpow2.f32 %v188_v37 }
 0x1ae   :  { %v286_v42 = vpop.eup %285 }
 0x1af   :  { %v190_v43 = vsel %vm46_vm1, 0.0, %v286_v42 }
 0x1b0   :  { %192 = vadd.xlane.f32.xlu0 %v190_v43 }
 0x1b2   :  { %v288_v47 = vpop.eup %287 }
 0x1b3   :  { %v191_v48 = vsel %vm47_vm5, 0.0, %v288_v47 }
 0x1b4   :  { %194 = vadd.xlane.f32.xlu1 %v191_v48  ;;  %176 = vadd.xlane.f32.xlu0 %v174_v46 }
 0x1b8   :  { %178 = vadd.xlane.f32.xlu0 %v175_v49 }
 0x1bc   :  { %182 = vadd.xlane.f32.xlu0 %v180_v50 }
 0x1c0   :  { %184 = vadd.xlane.f32.xlu0 %v181_v51 }
 0x239   :  { %v193_v52 = vpop.xlane.xlu0 %192 }
 0x23a   :  { %289 = vlog2.f32 %v193_v52 }
 0x23d   :  { %v195_v53 = vpop.xlane.xlu1 %194  ;;  %v177_v54 = vpop.xlane.xlu0 %176 }
 0x23e   :  { %291 = vlog2.f32 %v195_v53 }
 0x23f   :  { %293 = vrcp.f32 %v177_v54 }
 0x241   :  { %v179_v55 = vpop.xlane.xlu0 %178 }
 0x242   :  { %295 = vrcp.f32 %v179_v55 }
 0x245   :  { %v183_v58 = vpop.xlane.xlu0 %182 }
 0x247   :  { %v290_v56 = vpop.eup %289 }
 0x248   :  { %v197_v57 = vmul.f32 0.6931472, %v290_v56 }
 0x249   :  { %v185_v2 = vpop.xlane.xlu0 %184 }
 0x24a   :  { %v200_v59 = vmul.f32 %v197_v57, %v177_v54 }
 0x24b   :  { %v292_v60 = vpop.eup %291 }
 0x24c   :  { %v294_v61 = vpop.eup %293  ;;  %v199_v62 = vmul.f32 0.6931472, %v292_v60  ;;  %v202_v63 = vsub.f32 %v183_v58, %v200_v59 }
 0x24e   :  { %v201_v0 = vmul.f32 %v199_v62, %v179_v55  ;;  %v205_v1 = vmul.f32 %v294_v61, %v202_v63 }
 0x24f   :  { %v296_v5 = vpop.eup %295 }
 0x250   :  { %v208_v3 = vmul.f32 -1.0, %v205_v1  ;;  %v203_v4 = vsub.f32 %v185_v2, %v201_v0 }
 0x252   :  { %215 = vst.msk [vmem:[%s388_s5] sm:$0xff] %vm214_vm10, %v208_v3  ;;  %v207_v6 = vmul.f32 %v296_v5, %v203_v4 }
 0x254   :  { %v209_v7 = vmul.f32 -1.0, %v207_v6 }
 0x256   :  { %216 = vst.msk [vmem:[%s388_s5 + $0x8] sm:$0xff] %vm214_vm10, %v209_v7 }
 0x257   :  { %221 = vsyncpa [#allocation3], 1 }

</bundles_post_ra>
